<compile_context>
chip_gen: v5e
topology: v5e:2x2
jax: 0.10.0
libtpu: 0.0.40
codegen_flags: <defaults>
</compile_context>

<pallas_src>
import functools

import numpy as np
import jax
import jax.numpy as jnp
from jax.experimental import pallas as pl
from jax.experimental.pallas import tpu as pltpu


def _round_up(a, m):
    return -(-a // m) * m


def _make_knot_lane_constants(num_bases, degree, in_features, lane_width,
                              domain=(0.0, 1.0)):
    """Per-lane knot constants; lane layout m = k * in_features + j.

    Rows (each of length `lane_width`, zero beyond (num_bases+degree)*in_features):
      0              : knots[k]         (left knot, shared by every degree's left term)
      1              : knots[k + 1]     (right knot of the degree-0 indicator)
      2 + 3(d-1) + 0 : knots[k + d + 1]                        (d = 1..degree)
      2 + 3(d-1) + 1 : 1 / (knots[k + d]     - knots[k])       (masked to valid k)
      2 + 3(d-1) + 2 : 1 / (knots[k + d + 1] - knots[k + 1])   (masked to valid k)
    Lanes whose basis index k is invalid at degree d get zero reciprocals, so those
    lanes evaluate to exactly 0 and never pollute the GEMM.
    """
    K = num_bases + degree + 1               # number of knots
    nb0 = K - 1                               # number of degree-0 basis functions
    knots = np.linspace(domain[0], domain[1], K, dtype=np.float64)

    n_rows = 2 + 3 * degree
    out = np.zeros((n_rows, lane_width), dtype=np.float32)
    for k in range(nb0):
        sl = slice(k * in_features, (k + 1) * in_features)
        out[0, sl] = knots[k]
        out[1, sl] = knots[k + 1]
        for d in range(1, degree + 1):
            r = 2 + 3 * (d - 1)
            if k <= K - 2 - d:                 # valid output basis index at degree d
                out[r + 0, sl] = knots[k + d + 1]
                out[r + 1, sl] = 1.0 / (knots[k + d] - knots[k])
                out[r + 2, sl] = 1.0 / (knots[k + d + 1] - knots[k + 1])
    assert nb0 * in_features <= lane_width
    return out


def _linear_kan_kernel(x_ref, kc_ref, w_ref, o_ref, *, degree, in_features,
                       lane_width):
    # x_ref: (TB, F)   kc_ref: (2+3*degree, L)   w_ref: (L, O_pad)   o_ref: (TB, O_pad)
    F = in_features
    L = lane_width
    x = x_ref[...]                                        # (TB, F) f32

    # Broadcast x into the lane-packed layout xx[b, k*F + j] = x[b, j].
    reps = -(-L // F)
    xx = jnp.tile(x, (1, reps))[:, :L]                    # (TB, L)

    ka = kc_ref[0:1, :]                                   # knots[k]
    kb0 = kc_ref[1:2, :]                                  # knots[k+1]

    # Degree-0 indicator basis over all lanes at once (pad lanes -> 0).
    basis = ((xx >= ka) & (xx < kb0)).astype(jnp.float32)  # (TB, L)

    # Bottom-up Cox-de Boor; neighbor basis N_{k+1} fetched via a lane rotate (XLU),
    # invalid/pad lanes zeroed by the zero-padded reciprocal rows.
    for d in range(1, degree + 1):
        r = 2 + 3 * (d - 1)
        kb = kc_ref[r + 0:r + 1, :]                       # knots[k+d+1]
        il = kc_ref[r + 1:r + 2, :]                       # 1/(knots[k+d]   - knots[k])
        ir = kc_ref[r + 2:r + 3, :]                       # 1/(knots[k+d+1] - knots[k+1])
        shifted = pltpu.roll(basis, shift=L - F, axis=1)  # basis[k+1] into lane k
        basis = (xx - ka) * il * basis + (kb - xx) * ir * shifted

    # One fused MXU GEMM per batch tile (f32 operands, f32 accumulate).
    o_ref[...] = jnp.dot(basis, w_ref[...],
                         preferred_element_type=jnp.float32).astype(o_ref.dtype)


def linear_kan(x, coeff, num_bases, degree, *, block_b=128):
    """x: (B, F) float32; coeff: (O, F, num_bases) float32 (per-(out,in) spline coeffs)."""
    B, F = x.shape
    O, Fc, nb = coeff.shape
    assert Fc == F and nb == num_bases

    nb0 = num_bases + degree                   # number of degree-0 basis functions
    L = _round_up(nb0 * F, 128)                # lane-padded basis width (GEMM K dim)
    O_pad = _round_up(O, 128)                  # lane-dense output width

    kc = jnp.asarray(_make_knot_lane_constants(num_bases, degree, F, L))

    # w_full[k*F + j, i] = coeff[i, j, k] for k < num_bases; zero rows/cols elsewhere.
    w_flat = jnp.transpose(coeff, (2, 1, 0)).reshape(num_bases * F, O)
    w_full = jnp.pad(w_flat.astype(jnp.float32),
                     ((0, L - num_bases * F), (0, O_pad - O)))

    # Batch tiling: don't over-pad tiny batches, keep sublane (8) alignment.
    block_b = min(block_b, _round_up(B, 8))
    B_pad = _round_up(B, block_b)
    if B_pad != B:
        x = jnp.pad(x, ((0, B_pad - B), (0, 0)))

    kernel = functools.partial(_linear_kan_kernel, degree=degree,
                               in_features=F, lane_width=L)

    out = pl.pallas_call(
        kernel,
        out_shape=jax.ShapeDtypeStruct((B_pad, O_pad), jnp.float32),
        grid_spec=pltpu.PrefetchScalarGridSpec(
            num_scalar_prefetch=0,
            grid=(B_pad // block_b,),
            in_specs=[
                # x batch tile; F equals the full feature dim.
                pl.BlockSpec((block_b, F), lambda b: (b, 0)),
                # Tiny knot-constant table, resident across the batch grid.
                pl.BlockSpec((2 + 3 * degree, L), lambda b: (0, 0)),
                # Full weight slab, resident across the batch grid.
                pl.BlockSpec((L, O_pad), lambda b: (0, 0)),
            ],
            out_specs=pl.BlockSpec((block_b, O_pad), lambda b: (b, 0)),
        ),
        compiler_params=pltpu.CompilerParams(
            dimension_semantics=("parallel",),   # batch grid shards across TCs
            vmem_limit_bytes=32 * 1024 * 1024,
        ),
    )(x.astype(jnp.float32), kc, w_full)
    return out[:B, :O]


# Pure-JAX reference (standard Cox-de Boor recursion, used for checking).
def _bspline_basis_ref(x, degree, knots):
    if degree == 0:
        return ((x >= knots[:-1]) & (x < knots[1:])).astype(jnp.float32)
    left = (x - knots[:-(degree + 1)]) * _bspline_basis_ref(x, degree - 1, knots[:-1])
    left = left / (knots[degree:-1] - knots[:-(degree + 1)])
    right = (x - knots[degree + 1:]) * _bspline_basis_ref(x, degree - 1, knots[1:])
    right = right / (knots[1:-degree] - knots[degree + 1:])
    return left + right


if __name__ == "__main__":
    # Small shapes consistent with the module's forward: x is (batch, in_features).
    B, F, O = 16, 8, 32
    num_bases, degree = 8, 3

    key = jax.random.PRNGKey(0)
    kx, kcoef = jax.random.split(key)

    # Inputs inside the spline domain [0, 1) so the basis is non-degenerate.
    x = jax.random.uniform(kx, (B, F), dtype=jnp.float32)

    # One coefficient vector of length num_bases per (out_feature i, in_feature j),
    # matching the torch ModuleList index idx = i * in_features + j.
    coeff = jax.random.normal(kcoef, (O, F, num_bases), dtype=jnp.float32)

    out = linear_kan(x, coeff, num_bases, degree)
    out = jax.block_until_ready(out)

    knots_ref = jnp.linspace(0.0, 1.0, num_bases + degree + 1, dtype=jnp.float32)
    phi_ref = _bspline_basis_ref(x[:, :, None], degree, knots_ref)   # (B, F, nb)
    ref = jnp.einsum("bjk,ojk->bo", phi_ref, coeff)                   # (B, O)

    assert out.shape == (B, O)
    assert jnp.allclose(out, ref, atol=1e-4, rtol=1e-4)
    print("KERNEL_OK")
</pallas_src>

<mosaic_0001>
module attributes {stable_mosaic.version = 11 : i64} {
  func.func @_linear_kan_kernel(%arg0: i32, %arg1: memref<16x8xf32, #tpu.memory_space<vmem>>, %arg2: memref<11x128xf32, #tpu.memory_space<vmem>>, %arg3: memref<128x128xf32, #tpu.memory_space<vmem>>, %arg4: memref<16x128xf32, #tpu.memory_space<vmem>>) attributes {dimension_semantics = [#tpu.dimension_semantics<parallel>], iteration_bounds = array<i64: 1>, scalar_prefetch = 0 : i64, scratch_operands = 0 : i64, tpu.core_type = #tpu.core_type<tc>, window_params = [{transform_indices = @transform_0, window_bounds = array<i64: 16, 8>}, {pipeline_mode = #tpu.pipeline_mode<synchronous>, transform_indices = @transform_1, window_bounds = array<i64: 11, 128>}, {pipeline_mode = #tpu.pipeline_mode<synchronous>, transform_indices = @transform_2, window_bounds = array<i64: 128, 128>}, {transform_indices = @transform_3, window_bounds = array<i64: 16, 128>}]} {
    %c0 = arith.constant 0 : index
    %c0_0 = arith.constant 0 : index
    %0 = vector.load %arg1[%c0, %c0_0] : memref<16x8xf32, #tpu.memory_space<vmem>>, vector<16x8xf32>
    %1 = tpu.concatenate %0, %0, %0, %0, %0, %0, %0, %0, %0, %0, %0, %0, %0, %0, %0, %0 in 1 : vector<16x8xf32>, vector<16x8xf32>, vector<16x8xf32>, vector<16x8xf32>, vector<16x8xf32>, vector<16x8xf32>, vector<16x8xf32>, vector<16x8xf32>, vector<16x8xf32>, vector<16x8xf32>, vector<16x8xf32>, vector<16x8xf32>, vector<16x8xf32>, vector<16x8xf32>, vector<16x8xf32>, vector<16x8xf32> -> vector<16x128xf32>
    %c0_1 = arith.constant 0 : index
    %c0_2 = arith.constant 0 : index
    %2 = vector.load %arg2[%c0_1, %c0_2] : memref<11x128xf32, #tpu.memory_space<vmem>>, vector<1x128xf32>
    %c1 = arith.constant 1 : index
    %c0_3 = arith.constant 0 : index
    %3 = vector.load %arg2[%c1, %c0_3] : memref<11x128xf32, #tpu.memory_space<vmem>>, vector<1x128xf32>
    %4 = vector.broadcast %2 : vector<1x128xf32> to vector<16x128xf32>
    %5 = arith.cmpf oge, %1, %4 : vector<16x128xf32>
    %6 = vector.broadcast %3 : vector<1x128xf32> to vector<16x128xf32>
    %7 = arith.cmpf olt, %1, %6 : vector<16x128xf32>
    %8 = arith.andi %5, %7 : vector<16x128xi1>
    %9 = arith.extui %8 : vector<16x128xi1> to vector<16x128xi32>
    %10 = arith.sitofp %9 : vector<16x128xi32> to vector<16x128xf32>
    %c2 = arith.constant 2 : index
    %c0_4 = arith.constant 0 : index
    %11 = vector.load %arg2[%c2, %c0_4] : memref<11x128xf32, #tpu.memory_space<vmem>>, vector<1x128xf32>
    %c3 = arith.constant 3 : index
    %c0_5 = arith.constant 0 : index
    %12 = vector.load %arg2[%c3, %c0_5] : memref<11x128xf32, #tpu.memory_space<vmem>>, vector<1x128xf32>
    %c4 = arith.constant 4 : index
    %c0_6 = arith.constant 0 : index
    %13 = vector.load %arg2[%c4, %c0_6] : memref<11x128xf32, #tpu.memory_space<vmem>>, vector<1x128xf32>
    %c120_i32 = arith.constant 120 : i32
    %14 = tpu.dynamic_rotate %10 by %c120_i32 dim 1 : vector<16x128xf32>, i32 -> vector<16x128xf32>
    %15 = vector.broadcast %2 : vector<1x128xf32> to vector<16x128xf32>
    %16 = arith.subf %1, %15 : vector<16x128xf32>
    %17 = vector.broadcast %12 : vector<1x128xf32> to vector<16x128xf32>
    %18 = arith.mulf %16, %17 : vector<16x128xf32>
    %19 = arith.mulf %18, %10 : vector<16x128xf32>
    %20 = vector.broadcast %11 : vector<1x128xf32> to vector<16x128xf32>
    %21 = arith.subf %20, %1 : vector<16x128xf32>
    %22 = vector.broadcast %13 : vector<1x128xf32> to vector<16x128xf32>
    %23 = arith.mulf %21, %22 : vector<16x128xf32>
    %24 = arith.mulf %23, %14 : vector<16x128xf32>
    %25 = arith.addf %19, %24 : vector<16x128xf32>
    %c5 = arith.constant 5 : index
    %c0_7 = arith.constant 0 : index
    %26 = vector.load %arg2[%c5, %c0_7] : memref<11x128xf32, #tpu.memory_space<vmem>>, vector<1x128xf32>
    %c6 = arith.constant 6 : index
    %c0_8 = arith.constant 0 : index
    %27 = vector.load %arg2[%c6, %c0_8] : memref<11x128xf32, #tpu.memory_space<vmem>>, vector<1x128xf32>
    %c7 = arith.constant 7 : index
    %c0_9 = arith.constant 0 : index
    %28 = vector.load %arg2[%c7, %c0_9] : memref<11x128xf32, #tpu.memory_space<vmem>>, vector<1x128xf32>
    %c120_i32_10 = arith.constant 120 : i32
    %29 = tpu.dynamic_rotate %25 by %c120_i32_10 dim 1 : vector<16x128xf32>, i32 -> vector<16x128xf32>
    %30 = vector.broadcast %2 : vector<1x128xf32> to vector<16x128xf32>
    %31 = arith.subf %1, %30 : vector<16x128xf32>
    %32 = vector.broadcast %27 : vector<1x128xf32> to vector<16x128xf32>
    %33 = arith.mulf %31, %32 : vector<16x128xf32>
    %34 = arith.mulf %33, %25 : vector<16x128xf32>
    %35 = vector.broadcast %26 : vector<1x128xf32> to vector<16x128xf32>
    %36 = arith.subf %35, %1 : vector<16x128xf32>
    %37 = vector.broadcast %28 : vector<1x128xf32> to vector<16x128xf32>
    %38 = arith.mulf %36, %37 : vector<16x128xf32>
    %39 = arith.mulf %38, %29 : vector<16x128xf32>
    %40 = arith.addf %34, %39 : vector<16x128xf32>
    %c8 = arith.constant 8 : index
    %c0_11 = arith.constant 0 : index
    %41 = vector.load %arg2[%c8, %c0_11] : memref<11x128xf32, #tpu.memory_space<vmem>>, vector<1x128xf32>
    %c9 = arith.constant 9 : index
    %c0_12 = arith.constant 0 : index
    %42 = vector.load %arg2[%c9, %c0_12] : memref<11x128xf32, #tpu.memory_space<vmem>>, vector<1x128xf32>
    %c10 = arith.constant 10 : index
    %c0_13 = arith.constant 0 : index
    %43 = vector.load %arg2[%c10, %c0_13] : memref<11x128xf32, #tpu.memory_space<vmem>>, vector<1x128xf32>
    %c120_i32_14 = arith.constant 120 : i32
    %44 = tpu.dynamic_rotate %40 by %c120_i32_14 dim 1 : vector<16x128xf32>, i32 -> vector<16x128xf32>
    %45 = vector.broadcast %2 : vector<1x128xf32> to vector<16x128xf32>
    %46 = arith.subf %1, %45 : vector<16x128xf32>
    %47 = vector.broadcast %42 : vector<1x128xf32> to vector<16x128xf32>
    %48 = arith.mulf %46, %47 : vector<16x128xf32>
    %49 = arith.mulf %48, %40 : vector<16x128xf32>
    %50 = vector.broadcast %41 : vector<1x128xf32> to vector<16x128xf32>
    %51 = arith.subf %50, %1 : vector<16x128xf32>
    %52 = vector.broadcast %43 : vector<1x128xf32> to vector<16x128xf32>
    %53 = arith.mulf %51, %52 : vector<16x128xf32>
    %54 = arith.mulf %53, %44 : vector<16x128xf32>
    %55 = arith.addf %49, %54 : vector<16x128xf32>
    %c0_15 = arith.constant 0 : index
    %c0_16 = arith.constant 0 : index
    %56 = vector.load %arg3[%c0_15, %c0_16] : memref<128x128xf32, #tpu.memory_space<vmem>>, vector<128x128xf32>
    %cst = arith.constant dense<0.000000e+00> : vector<16x128xf32>
    %57 = tpu.matmul %55, %56, %cst {dimension_numbers = #tpu.dot_dimension_numbers<[1], [0], [0], [1], [0, 0, 1, 1], [], []>} : vector<16x128xf32>, vector<128x128xf32>, vector<16x128xf32> -> vector<16x128xf32>
    %c0_17 = arith.constant 0 : index
    %c0_18 = arith.constant 0 : index
    %58 = vector.load %arg4[%c0_17, %c0_18] : memref<16x128xf32, #tpu.memory_space<vmem>>, vector<16x128xf32>
    tpu.vector_store %arg4[%c0_17, %c0_18], %57 {strides = array<i32>} : memref<16x128xf32, #tpu.memory_space<vmem>>, vector<16x128xf32>,
    return
  }
  func.func @transform_0(%arg0: i32) -> (i32, i32) {
    %c0_i32 = arith.constant 0 : i32
    %c0_i32_0 = arith.constant 0 : i32
    return %arg0, %c0_i32 : i32, i32
  }
  func.func @transform_1(%arg0: i32) -> (i32, i32) {
    %c0_i32 = arith.constant 0 : i32
    %c0_i32_0 = arith.constant 0 : i32
    %c0_i32_1 = arith.constant 0 : i32
    return %c0_i32, %c0_i32_0 : i32, i32
  }
  func.func @transform_2(%arg0: i32) -> (i32, i32) {
    %c0_i32 = arith.constant 0 : i32
    %c0_i32_0 = arith.constant 0 : i32
    %c0_i32_1 = arith.constant 0 : i32
    return %c0_i32, %c0_i32_0 : i32, i32
  }
  func.func @transform_3(%arg0: i32) -> (i32, i32) {
    %c0_i32 = arith.constant 0 : i32
    %c0_i32_0 = arith.constant 0 : i32
    return %arg0, %c0_i32 : i32, i32
  }
}

</mosaic_0001>

<bundles_post_ra>
// kernel: tpu_custom_call.1
= control target key start
LH: loop header
LB: loop body
LE: loop exit
PB: predicated region body
PF: predicated region fallthrough
CT: control target
= control target key end

     0   :  { %8 = vsyncpa [#allocation3], 0  ;;  %s573_s0 = inlined_call_operand.vmem [shape: f32[16,8], index: 0, kind: input, shape index: {}]   ;;  %s574_s1 = inlined_call_operand.vmem [shape: f32[11,128], index: 1, kind: input, shape index: {}]   ;;  %s575_s2 = inlined_call_operand.hbm [shape: f32[128,128], index: 2, kind: input, shape index: {}]   ;;  %s576_s3 = inlined_call_operand.hbm [shape: f32[16,128], index: 3, kind: output, shape index: {}]  }
   0x1   :  { %9 = vsyncpa [#allocation4], 0  ;;  %s18_s14 = sshll.u32 %s575_s2, 4  ;;  %s417_s15 = smov [#allocation2]   ;;  %s19_s14 = int_to_ptr.hbm [resolvable:$true] %s18_s14 }
   0x2   :  { %s20_s16 = sshll.u32 %s417_s15, 4  ;;  %s418_s17 = smov 128   ;;  %s21_s16 = int_to_ptr.vmem [resolvable:$true] %s20_s16 }
   0x3   :  { %s419_s18 = smov 8  }
   0x4   :  { %26 = dma.hbm_to_vmem [thread:$0]  %s19_s14, 2048, %s21_s16, [#allocation3], %s418_s17, %s418_s17, %s419_s18  }
   0x5   :  { %413 = dma.done.wait [#allocation3], 2048  }
   0x6   :  { %414 = vsyncadd [#allocation3], 4294965248  ;;  %v465_v0 = vld [vmem:[%s573_s0] sm:$0xff]  ;;  %s420_s21 = smov 16   ;;  %s421_s2 = smov 24   ;;  %v474_v1 = vld [vmem:[%s573_s0 + $0x8] sm:$0xff] }
   0x7   :  { %41 = vrot.lane.b32.xlu1 %v465_v0, %s420_s21  ;;  %35 = vrot.lane.b32.xlu0 %v465_v0, %s419_s18  ;;  %s422_s24 = smov 32   ;;  %s423_s25 = smov 40   ;;  %vm125_vm0 = vcmask 64512   ;;  %vm128_vm1 = vcmask 130048   ;;  %vm131_vm2 = vcmask 195584   ;;  %vm134_vm3 = vcmask 261120  }
   0x8   :  { %47 = vrot.lane.b32.xlu2 %v465_v0, %s421_s2  ;;  %s424_s26 = smov 48   ;;  %s425_s0 = smov 56   ;;  %vm137_vm4 = vcmask 326656   ;;  %vm140_vm5 = vcmask 392192   ;;  %vm143_vm6 = vcmask 457728   ;;  %vm146_vm7 = vcmask 523264  }
   0x9   :  { %s426_s27 = smov 64   ;;  %s427_s28 = smov 72   ;;  %vm149_vm8 = vcmask 588800   ;;  %vm152_vm9 = vcmask 654336   ;;  %vm155_vm10 = vcmask 719872   ;;  %vm158_vm11 = vcmask 785408  }
   0xa   :  { %s428_s29 = smov 80   ;;  %s429_s30 = smov 88   ;;  %vm161_vm12 = vcmask 850944   ;;  %vm164_vm13 = vcmask 916480   ;;  %vm167_vm14 = vcmask 982016  }
   0xb   :  { %s430_s4 = smov 96   ;;  %s431_s5 = smov 104   ;;  %v354_v53 = vld [vmem:[%s574_s1] ss:$0 sm:$0xff]  ;;  %v355_v54 = vld [vmem:[%s574_s1 + $0x1] ss:$0 sm:$0xff] }
   0xc   :  { %s432_s6 = smov 112   ;;  %s433_s7 = smov 120   ;;  %v358_v61 = vld [vmem:[%s574_s1 + $0x3] ss:$0 sm:$0xff] }
   0xf   :  { %43 = vrot.lane.b32.xlu1 %v474_v1, %s420_s21  ;;  %37 = vrot.lane.b32.xlu0 %v474_v1, %s419_s18 }
  0x10   :  { %49 = vrot.lane.b32.xlu2 %v474_v1, %s421_s2 }
  0x17   :  { %55 = vrot.lane.b32.xlu1 %v474_v1, %s422_s24  ;;  %53 = vrot.lane.b32.xlu0 %v465_v0, %s422_s24 }
  0x18   :  { %59 = vrot.lane.b32.xlu2 %v465_v0, %s423_s25 }
  0x1f   :  { %65 = vrot.lane.b32.xlu1 %v465_v0, %s424_s26  ;;  %61 = vrot.lane.b32.xlu0 %v474_v1, %s423_s25 }
  0x20   :  { %67 = vrot.lane.b32.xlu2 %v474_v1, %s424_s26 }
  0x27   :  { %73 = vrot.lane.b32.xlu1 %v474_v1, %s425_s0  ;;  %71 = vrot.lane.b32.xlu0 %v465_v0, %s425_s0 }
  0x28   :  { %77 = vrot.lane.b32.xlu2 %v465_v0, %s426_s27 }
  0x2f   :  { %83 = vrot.lane.b32.xlu1 %v465_v0, %s427_s28  ;;  %79 = vrot.lane.b32.xlu0 %v474_v1, %s426_s27 }
  0x30   :  { %85 = vrot.lane.b32.xlu2 %v474_v1, %s427_s28 }
  0x37   :  { %91 = vrot.lane.b32.xlu1 %v474_v1, %s428_s29  ;;  %89 = vrot.lane.b32.xlu0 %v465_v0, %s428_s29 }
  0x38   :  { %95 = vrot.lane.b32.xlu2 %v465_v0, %s429_s30 }
  0x3f   :  { %101 = vrot.lane.b32.xlu1 %v465_v0, %s430_s4  ;;  %97 = vrot.lane.b32.xlu0 %v474_v1, %s429_s30  ;;  %s435_s30 = smov [#allocation5]  }
  0x40   :  { %103 = vrot.lane.b32.xlu2 %v474_v1, %s430_s4  ;;  %s297_s4 = sshll.u32 %s435_s30, 4  ;;  %s298_s4 = int_to_ptr.vmem [resolvable:$true] %s297_s4 }
  0x47   :  { %109 = vrot.lane.b32.xlu1 %v474_v1, %s431_s5  ;;  %107 = vrot.lane.b32.xlu0 %v465_v0, %s431_s5 }
  0x48   :  { %113 = vrot.lane.b32.xlu2 %v465_v0, %s432_s6 }
  0x4f   :  { %119 = vrot.lane.b32.xlu1 %v465_v0, %s433_s7  ;;  %115 = vrot.lane.b32.xlu0 %v474_v1, %s432_s6 }
  0x50   :  { %121 = vrot.lane.b32.xlu2 %v474_v1, %s433_s7 }
  0x62   :  { %v48_v2 = vpop.permute.xlu2 %47 }
  0x6a   :  { %v50_v3 = vpop.permute.xlu2 %49 }
  0x72   :  { %v60_v6 = vpop.permute.xlu2 %59 }
  0x79   :  { %v42_v4 = vpop.permute.xlu1 %41  ;;  %v36_v5 = vpop.permute.xlu0 %35 }
  0x7a   :  { %v68_v9 = vpop.permute.xlu2 %67  ;;  %v126_v21 = vsel %vm125_vm0, %v465_v0, %v36_v5 }
  0x7b   :  { %v129_v24 = vsel %vm128_vm1, %v126_v21, %v42_v4 }
  0x7c   :  { %v132_v27 = vsel %vm131_vm2, %v129_v24, %v48_v2 }
  0x81   :  { %v44_v7 = vpop.permute.xlu1 %43  ;;  %v38_v8 = vpop.permute.xlu0 %37 }
  0x82   :  { %v78_v12 = vpop.permute.xlu2 %77  ;;  %v127_v25 = vsel %vm125_vm0, %v474_v1, %v38_v8 }
  0x83   :  { %v130_v28 = vsel %vm128_vm1, %v127_v25, %v44_v7 }
  0x84   :  { %v133_v30 = vsel %vm131_vm2, %v130_v28, %v50_v3  ;;  %v434_v3 = vmov 0.0  }
  0x89   :  { %v56_v10 = vpop.permute.xlu1 %55  ;;  %v54_v11 = vpop.permute.xlu0 %53 }
  0x8a   :  { %v86_v15 = vpop.permute.xlu2 %85  ;;  %v135_v29 = vsel %vm134_vm3, %v132_v27, %v54_v11  ;;  %v136_v33 = vsel %vm134_vm3, %v133_v30, %v56_v10  ;;  %v356_v11 = vld [vmem:[%s574_s1 + $0x2] ss:$0 sm:$0xff] }
  0x8b   :  { %v138_v34 = vsel %vm137_vm4, %v135_v29, %v60_v6  ;;  %v360_v29 = vld [vmem:[%s574_s1 + $0x5] ss:$0 sm:$0xff] }
  0x91   :  { %v66_v13 = vpop.permute.xlu1 %65  ;;  %v62_v14 = vpop.permute.xlu0 %61 }
  0x92   :  { %v96_v20 = vpop.permute.xlu2 %95  ;;  %v141_v35 = vsel %vm140_vm5, %v138_v34, %v66_v13  ;;  %v139_v36 = vsel %vm137_vm4, %v136_v33, %v62_v14  ;;  %v357_v14 = vld [vmem:[%s574_s1 + $0x4] ss:$0 sm:$0xff]  ;;  %v266_v33 = vld [vmem:[#allocation2 + $0x70] sm:$0xff] }
  0x93   :  { %v142_v38 = vsel %vm140_vm5, %v139_v36, %v68_v9  ;;  %v364_v36 = vld [vmem:[%s574_s1 + $0x9] ss:$0 sm:$0xff] }
  0x99   :  { %v74_v16 = vpop.permute.xlu1 %73  ;;  %v72_v17 = vpop.permute.xlu0 %71 }
  0x9a   :  { %v104_v26 = vpop.permute.xlu2 %103  ;;  %v144_v37 = vsel %vm143_vm6, %v141_v35, %v72_v17  ;;  %v145_v40 = vsel %vm143_vm6, %v142_v38, %v74_v16  ;;  %v265_v35 = vld [vmem:[#allocation2 + $0x68] sm:$0xff] }
  0x9b   :  { %v147_v41 = vsel %vm146_vm7, %v144_v37, %v78_v12 }
  0xa1   :  { %v84_v18 = vpop.permute.xlu1 %83  ;;  %v80_v19 = vpop.permute.xlu0 %79 }
  0xa2   :  { %v114_v39 = vpop.permute.xlu2 %113  ;;  %v150_v42 = vsel %vm149_vm8, %v147_v41, %v84_v18  ;;  %v148_v43 = vsel %vm146_vm7, %v145_v40, %v80_v19  ;;  %v263_v41 = vld [vmem:[#allocation2 + $0x58] sm:$0xff] }
  0xa3   :  { %v151_v47 = vsel %vm149_vm8, %v148_v43, %v86_v15  ;;  %v262_v43 = vld [vmem:[#allocation2 + $0x50] sm:$0xff] }
  0xa9   :  { %v92_v22 = vpop.permute.xlu1 %91  ;;  %v90_v23 = vpop.permute.xlu0 %89 }
  0xaa   :  { %v153_v44 = vsel %vm152_vm9, %v150_v42, %v90_v23  ;;  %v154_v48 = vsel %vm152_vm9, %v151_v47, %v92_v22  ;;  %v122_v56 = vpop.permute.xlu2 %121  ;;  %v259_v47 = vld [vmem:[#allocation2 + $0x38] sm:$0xff] }
  0xab   :  { %v156_v49 = vsel %vm155_vm10, %v153_v44, %v96_v20  ;;  %v359_v20 = vld [vmem:[%s574_s1 + $0x6] ss:$0 sm:$0xff] }
  0xb1   :  { %v102_v31 = vpop.permute.xlu1 %101  ;;  %v98_v32 = vpop.permute.xlu0 %97 }
  0xb2   :  { %v159_v50 = vsel %vm158_vm11, %v156_v49, %v102_v31  ;;  %v157_v51 = vsel %vm155_vm10, %v154_v48, %v98_v32  ;;  %v361_v31 = vld [vmem:[%s574_s1 + $0x7] ss:$0 sm:$0xff]  ;;  %v267_v32 = vld [vmem:[#allocation2 + $0x78] sm:$0xff]  ;;  %v258_v48 = vld [vmem:[#allocation2 + $0x30] sm:$0xff] }
  0xb3   :  { %v160_v55 = vsel %vm158_vm11, %v157_v51, %v104_v26  ;;  %314 = vmatpush.msra.mxu1 %v267_v32  ;;  %268 = vmatpush.msra.mxu0 %v267_v32  ;;  %v257_v49 = vld [vmem:[#allocation2 + $0x28] sm:$0xff] }
  0xb5   :  { %315 = vmatpush.msra.mxu1 %v266_v33  ;;  %269 = vmatpush.msra.mxu0 %v266_v33 }
  0xb7   :  { %316 = vmatpush.msra.mxu1 %v265_v35  ;;  %270 = vmatpush.msra.mxu0 %v265_v35 }
  0xb9   :  { %v110_v45 = vpop.permute.xlu1 %109  ;;  %v108_v46 = vpop.permute.xlu0 %107 }
  0xba   :  { %v162_v52 = vsel %vm161_vm12, %v159_v50, %v108_v46  ;;  %v163_v57 = vsel %vm161_vm12, %v160_v55, %v110_v45  ;;  %v261_v45 = vld [vmem:[#allocation2 + $0x48] sm:$0xff]  ;;  %v260_v46 = vld [vmem:[#allocation2 + $0x40] sm:$0xff] }
  0xbb   :  { %v165_v58 = vsel %vm164_vm13, %v162_v52, %v114_v39  ;;  %v264_v39 = vld [vmem:[#allocation2 + $0x60] sm:$0xff]  ;;  %v255_v52 = vld [vmem:[#allocation2 + $0x18] sm:$0xff] }
  0xbc   :  { %317 = vmatpush.msra.mxu1 %v264_v39  ;;  %271 = vmatpush.msra.mxu0 %v264_v39  ;;  %v256_v50 = vld [vmem:[#allocation2 + $0x20] sm:$0xff] }
  0xbe   :  { %318 = vmatpush.msra.mxu1 %v263_v41  ;;  %272 = vmatpush.msra.mxu0 %v263_v41 }
  0xc0   :  { %319 = vmatpush.msra.mxu1 %v262_v43  ;;  %273 = vmatpush.msra.mxu0 %v262_v43 }
  0xc1   :  { %v120_v59 = vpop.permute.xlu1 %119  ;;  %v116_v60 = vpop.permute.xlu0 %115 }
  0xc2   :  { %v517_v62 = vsel %vm167_vm14, %v165_v58, %v120_v59  ;;  %v166_v63 = vsel %vm164_vm13, %v163_v57, %v116_v60  ;;  %320 = vmatpush.msra.mxu1 %v261_v45  ;;  %274 = vmatpush.msra.mxu0 %v261_v45  ;;  %v253_v60 = vld [vmem:[#allocation2 + $0x8] sm:$0xff] }
  0xc3   :  { %v520_v0 = vsub.f32 %v517_v62, %v354_v53  ;;  %v522_v1 = vsel %vm167_vm14, %v166_v63, %v122_v56  ;;  %vm173_vm15 = vcmp.ge.f32.partialorder %v517_v62, %v354_v53  ;;  %vm176_vm0 = vcmp.lt.f32.partialorder %v517_v62, %v355_v54  ;;  %v362_v63 = vld [vmem:[%s574_s1 + $0x8] ss:$0 sm:$0xff] }
  0xc4   :  { %v192_v2 = vsub.f32 %v522_v1, %v354_v53  ;;  %vm174_vm1 = vcmp.ge.f32.partialorder %v522_v1, %v354_v53  ;;  %vm177_vm2 = vcmp.lt.f32.partialorder %v522_v1, %v355_v54  ;;  %vm178_vm3 = vmand %vm173_vm15, %vm176_vm0  ;;  %v199_v12 = vsub.f32 %v356_v11, %v517_v62  ;;  %321 = vmatpush.msra.mxu1 %v260_v46  ;;  %v254_v53 = vld [vmem:[#allocation2 + $0x10] sm:$0xff] }
  0xc5   :  { %vm179_vm4 = vmand %vm174_vm1, %vm177_vm2  ;;  %v312_v4 = vsel %vm178_vm3, 1.0, %v434_v3  ;;  %v194_v5 = vmul.f32 %v358_v61, %v520_v0  ;;  %v200_v13 = vsub.f32 %v356_v11, %v522_v1  ;;  %v216_v26 = vmul.f32 %v359_v20, %v520_v0  ;;  %275 = vmatpush.msra.mxu0 %v260_v46 }
  0xc6   :  { %v313_v6 = vsel %vm179_vm4, 1.0, %v434_v3  ;;  %v195_v7 = vmul.f32 %v358_v61, %v192_v2  ;;  %v202_v16 = vmul.f32 %v357_v14, %v199_v12  ;;  %v217_v25 = vmul.f32 %v359_v20, %v192_v2  ;;  %322 = vmatpush.msra.mxu1 %v259_v47  ;;  %v252_v61 = vld [vmem:[#allocation2] sm:$0xff]  ;;  %v363_v3 = vld [vmem:[%s574_s1 + $0xa] ss:$0 sm:$0xff]  ;;  %s299_s1 = sshll.u32 %s576_s3, 4  ;;  %s300_s1 = int_to_ptr.hbm [resolvable:$true] %s299_s1 }
  0xc7   :  { %v349_v8 = vpack.i.bf16 %v313_v6, %v312_v4  ;;  %v196_v9 = vmul.f32 %v312_v4, %v194_v5  ;;  %v203_v17 = vmul.f32 %v357_v14, %v200_v13  ;;  %v222_v30 = vsub.f32 %v360_v29, %v522_v1  ;;  %276 = vmatpush.msra.mxu0 %v259_v47 }
  0xc8   :  { %v197_v10 = vmul.f32 %v313_v6, %v195_v7  ;;  %v239_v42 = vmul.f32 %v364_v36, %v192_v2  ;;  %323 = vmatpush.msra.mxu1 %v258_v48  ;;  %v221_v51 = vsub.f32 %v360_v29, %v517_v62  ;;  %v238_v58 = vmul.f32 %v364_v36, %v520_v0 }
  0xc9   :  { %350 = vrot.lane.b32.xlu0 %v349_v8, %s433_s7  ;;  %v225_v34 = vmul.f32 %v361_v31, %v222_v30  ;;  %277 = vmatpush.msra.mxu0 %v258_v48  ;;  %v244_v2 = vsub.f32 %v362_v63, %v522_v1  ;;  %v243_v7 = vsub.f32 %v362_v63, %v517_v62 }
  0xca   :  { %324 = vmatpush.msra.mxu1 %v257_v49  ;;  %v224_v54 = vmul.f32 %v361_v31, %v221_v51 }
  0xcb   :  { %278 = vmatpush.msra.mxu0 %v257_v49  ;;  %v247_v0 = vmul.f32 %v363_v3, %v244_v2  ;;  %v246_v8 = vmul.f32 %v363_v3, %v243_v7 }
  0xcc   :  { %325 = vmatpush.msra.mxu1 %v256_v50 }
  0xcd   :  { %279 = vmatpush.msra.mxu0 %v256_v50 }
  0xce   :  { %326 = vmatpush.msra.mxu1 %v255_v52 }
  0xcf   :  { %280 = vmatpush.msra.mxu0 %v255_v52 }
  0xd0   :  { %327 = vmatpush.msra.mxu1 %v254_v53 }
  0xd1   :  { %281 = vmatpush.msra.mxu0 %v254_v53 }
  0xd2   :  { %328 = vmatpush.msra.mxu1 %v253_v60 }
  0xd3   :  { %282 = vmatpush.msra.mxu0 %v253_v60 }
  0xd4   :  { %329 = vmatpush.msra.mxu1 %v252_v61 }
  0xd5   :  { %283 = vmatpush.msra.mxu0 %v252_v61 }
 0x13b   :  { %v351_v15 = vpop.permute.xlu0 %350 }
 0x13c   :  { %v353_v18 = vunpack.i.h.bf16 %v351_v15  ;;  %v352_v19 = vunpack.i.l.bf16 %v351_v15 }
 0x13e   :  { %v205_v21 = vmul.f32 %v353_v18, %v203_v17  ;;  %v204_v22 = vmul.f32 %v352_v19, %v202_v16 }
 0x140   :  { %v206_v23 = vadd.f32 %v204_v22, %v196_v9  ;;  %v207_v24 = vadd.f32 %v205_v21, %v197_v10 }
 0x142   :  { %211 = vrot.lane.b32.xlu1 %v206_v23, %s433_s7  ;;  %213 = vrot.lane.b32.xlu2 %v207_v24, %s433_s7  ;;  %v219_v27 = vmul.f32 %v217_v25, %v207_v24  ;;  %v218_v28 = vmul.f32 %v216_v26, %v206_v23 }
 0x19c   :  { %v214_v37 = vpop.permute.xlu2 %213 }
 0x19d   :  { %v227_v38 = vmul.f32 %v225_v34, %v214_v37 }
 0x19f   :  { %v229_v40 = vadd.f32 %v227_v38, %v219_v27 }
 0x1a1   :  { %235 = vrot.lane.b32.xlu1 %v229_v40, %s433_s7  ;;  %v241_v44 = vmul.f32 %v239_v42, %v229_v40 }
 0x1b4   :  { %v212_v55 = vpop.permute.xlu1 %211 }
 0x1b5   :  { %v226_v56 = vmul.f32 %v224_v54, %v212_v55 }
 0x1b7   :  { %v228_v57 = vadd.f32 %v226_v56, %v218_v28 }
 0x1b9   :  { %233 = vrot.lane.b32.xlu0 %v228_v57, %s433_s7  ;;  %v240_v59 = vmul.f32 %v238_v58, %v228_v57 }
 0x213   :  { %v236_v4 = vpop.permute.xlu1 %235 }
 0x214   :  { %v249_v5 = vmul.f32 %v247_v0, %v236_v4 }
 0x216   :  { %v251_v6 = vadd.f32 %v249_v5, %v241_v44 }
 0x218   :  { %287 = vmatmul.f32.vlgmr.msra.gmra.mxu1 %v251_v6 }
 0x22b   :  { %v234_v9 = vpop.permute.xlu0 %233 }
 0x22c   :  { %v248_v10 = vmul.f32 %v246_v8, %v234_v9 }
 0x22e   :  { %v250_v11 = vadd.f32 %v248_v10, %v240_v59 }
 0x230   :  { %284 = vmatmul.f32.vlgmr.msra.gmra.mxu0 %v250_v11 }
 0x295   :  { %v288_v12 = vpop.f32.mrf.mxu1 }
 0x296   :  { %292 = vst [vmem:[#allocation5 + $0x8] sm:$0xff] %v288_v12 }
 0x2ad   :  { %v285_v1 = vpop.f32.mrf.mxu0 }
 0x2ae   :  { %291 = vst [vmem:[#allocation5] sm:$0xff] %v285_v1 }
 0x2af   :  { %305 = dma.vmem_to_hbm [thread:$0]  %s298_s4, 256, %s300_s1, [#allocation4], %s418_s17, %s418_s17, %s419_s18  }
 0x2b0   :  { %415 = dma.done.wait [#allocation4], 256  }
 0x2b1   :  { %416 = vsyncadd [#allocation4], 4294967040 }
 0x2b2   :  { %310 = vsyncpa [#allocation3], 1 }
 0x2b3   :  { %311 = vsyncpa [#allocation4], 1 }

</bundles_post_ra>
